<compile_context>
chip_gen: v7x
topology: tpu7x:2x2x1
jax: 0.10.0
libtpu: 0.0.40
codegen_flags: <defaults>
</compile_context>

<pallas_src>
import math

import jax
import jax.numpy as jnp
from jax.experimental import pallas as pl
from jax.experimental.pallas import tpu as pltpu

_LANES = 128
_SUBLANES = 8
_DEFAULT_TILE_BYTES = 5 * 1024 * 1024     # ~5 MiB x tiles (review: 4-7 MiB sweet spot)
_VMEM_LIMIT_BYTES = 32 * 1024 * 1024      # explicit scoped-VMEM limit (v5e default is 16 MiB)
_MIN_PALLAS_BYTES = 256 * 1024            # below this, fused XLA beats kernel launch overhead


def _center_kernel(x_ref, mean_ref, o_ref):
    # Elementwise subtraction; mean broadcasts over the leading (batch-chunk)
    # axis of the x tile. Everything stays in x.dtype (no in-kernel casts).
    o_ref[...] = x_ref[...] - mean_ref[...]


def _pick_batch_chunk(B, max_bc, min_chunks):
    """Pick (bc, num_chunks) with bc <= max_bc, num_chunks >= min_chunks,
    preferring a bc that divides B exactly (all grid steps full/unmasked)."""
    max_bc = max(1, min(B, max_bc))
    min_chunks = max(min_chunks, pl.cdiv(B, max_bc))
    # Accept up to 2x the minimum number of chunks to find an exact divisor
    # (per-step overhead is ~0.35 us, negligible at these chunk sizes).
    for nc in range(min_chunks, 2 * min_chunks + 1):
        if B % nc == 0 and B // nc <= max_bc:
            return B // nc, nc
    bc = pl.cdiv(B, min_chunks)
    return bc, pl.cdiv(B, bc)


def center(x, mean, *,
           target_tile_bytes=_DEFAULT_TILE_BYTES,
           min_pallas_bytes=_MIN_PALLAS_BYTES):
    """x: (B, *feat_dims), mean: (*feat_dims) -> x - mean (broadcast over batch)."""
    assert x.shape[1:] == mean.shape, "Unconsistent shapes"
    B = x.shape[0]
    feat = math.prod(mean.shape)
    itemsize = jnp.dtype(x.dtype).itemsize

    # Cast mean once in the wrapper so the kernel subtraction stays in x.dtype.
    mean = mean.astype(x.dtype)

    # Small-input bypass: kernel launch + single grid step is pure fixed
    # overhead for tiny arrays; XLA's fused elementwise op is strictly faster.
    if B * feat * itemsize < min_pallas_bytes:
        return x - mean[None]

    # Pad the flattened feature axis up to a lane multiple so every tile is a
    # lane-dense (., 128) block; padding is sliced off the output.
    feat_pad = pl.cdiv(feat, _LANES) * _LANES
    x2 = x.reshape(B, feat)
    m1 = mean.reshape(feat)
    if feat_pad != feat:
        x2 = jnp.pad(x2, ((0, 0), (0, feat_pad - feat)))
        m1 = jnp.pad(m1, ((0, feat_pad - feat),))
    R = feat_pad // _LANES
    x3 = x2.reshape(B, R, _LANES)
    m2 = m1.reshape(R, _LANES)

    # ---- Tile sizing ----
    # VMEM usage ~= 2*x_tile (double-buffered in) + 2*x_tile (out) + 2*mean_tile.
    row_bytes = feat_pad * itemsize
    if row_bytes > target_tile_bytes and R % _SUBLANES == 0:
        # A single batch row exceeds the tile budget: also tile the feature
        # axis (partial-block sublane dim must stay a multiple of 8).
        rc = ((target_tile_bytes // 2) // (_LANES * itemsize)) // _SUBLANES * _SUBLANES
        rc = min(R, max(_SUBLANES, rc))
    else:
        # TODO(synk): if R is huge and not a multiple of 8 this single-row tile
        # could exceed the VMEM budget; handle by padding R if it ever matters.
        rc = R
    tile_row_bytes = rc * _LANES * itemsize
    max_bc = max(1, target_tile_bytes // tile_row_bytes)

    # Even batch chunks, and >= 2 chunks when B >= 2 so the parallel batch axis
    # can be split across both v7x TensorCores.
    min_chunks = 2 if B >= 2 else 1
    bc, num_bc = _pick_batch_chunk(B, max_bc, min_chunks)
    num_rc = pl.cdiv(R, rc)

    out = pl.pallas_call(
        _center_kernel,
        out_shape=jax.ShapeDtypeStruct((B, R, _LANES), x.dtype),
        grid_spec=pltpu.PrefetchScalarGridSpec(
            num_scalar_prefetch=0,
            # Batch axis innermost: the mean block index is constant across
            # consecutive steps, so it stays resident in VMEM.
            grid=(num_rc, num_bc),
            in_specs=[
                pl.BlockSpec((bc, rc, _LANES), lambda j, i: (i, j, 0)),
                pl.BlockSpec((rc, _LANES), lambda j, i: (j, 0)),
            ],
            out_specs=pl.BlockSpec((bc, rc, _LANES), lambda j, i: (i, j, 0)),
        ),
        compiler_params=pltpu.CompilerParams(
            dimension_semantics=("parallel", "parallel"),
            vmem_limit_bytes=_VMEM_LIMIT_BYTES,
        ),
        cost_estimate=pl.CostEstimate(
            flops=B * feat_pad,
            transcendentals=0,
            bytes_accessed=(2 * B * feat_pad + feat_pad) * itemsize,
        ),
    )(x3, m2)

    out = out.reshape(B, feat_pad)
    if feat_pad != feat:
        out = out[:, :feat]
    return out.reshape(x.shape)


if __name__ == "__main__":
    key = jax.random.PRNGKey(0)
    kx, km, kx2, km2 = jax.random.split(key, 4)

    ok = True

    # 1) Spec shape (B, C, H, W) = (2, 4, 16, 16); force the Pallas path
    #    (otherwise the small-input bypass would handle this tiny array).
    B, C, H, W = 2, 4, 16, 16
    x = jax.random.normal(kx, (B, C, H, W), dtype=jnp.float32)
    mean = jax.random.normal(km, (C, H, W), dtype=jnp.float32)
    out = jax.block_until_ready(center(x, mean, min_pallas_bytes=0))
    ref = x - mean[None]
    ok &= out.shape == x.shape and bool(jnp.allclose(out, ref, atol=1e-6))

    # 2) Default path (small-input bypass) on the same data.
    out_bypass = jax.block_until_ready(center(x, mean))
    ok &= bool(jnp.allclose(out_bypass, ref, atol=1e-6))

    # 3) Non-lane-aligned feature size (exercises the padding path).
    x_na = jax.random.normal(kx2, (4, 3, 10, 10), dtype=jnp.float32)
    mean_na = jax.random.normal(km2, (3, 10, 10), dtype=jnp.float32)
    out_na = jax.block_until_ready(center(x_na, mean_na, min_pallas_bytes=0))
    ok &= bool(jnp.allclose(out_na, x_na - mean_na[None], atol=1e-6))

    assert ok, "mismatch vs reference"
    print("KERNEL_OK")
</pallas_src>

<mosaic_0001>
module attributes {stable_mosaic.version = 11 : i64} {
  func.func @_center_kernel(%arg0: i32, %arg1: i32, %arg2: memref<1x8x128xf32, #tpu.memory_space<vmem>>, %arg3: memref<8x128xf32, #tpu.memory_space<vmem>>, %arg4: memref<1x8x128xf32, #tpu.memory_space<vmem>>) attributes {dimension_semantics = [#tpu.dimension_semantics<parallel>, #tpu.dimension_semantics<parallel>], iteration_bounds = array<i64: 1, 2>, scalar_prefetch = 0 : i64, scratch_operands = 0 : i64, tpu.core_type = #tpu.core_type<tc>, window_params = [{transform_indices = @transform_0, window_bounds = array<i64: 1, 8, 128>}, {transform_indices = @transform_1, window_bounds = array<i64: 8, 128>}, {transform_indices = @transform_2, window_bounds = array<i64: 1, 8, 128>}]} {
    %c0 = arith.constant 0 : index
    %c0_0 = arith.constant 0 : index
    %c0_1 = arith.constant 0 : index
    %0 = vector.load %arg2[%c0, %c0_0, %c0_1] : memref<1x8x128xf32, #tpu.memory_space<vmem>>, vector<1x8x128xf32>
    %c0_2 = arith.constant 0 : index
    %c0_3 = arith.constant 0 : index
    %1 = vector.load %arg3[%c0_2, %c0_3] : memref<8x128xf32, #tpu.memory_space<vmem>>, vector<8x128xf32>
    %2 = vector.shape_cast %1 : vector<8x128xf32> to vector<1x8x128xf32>
    %3 = arith.subf %0, %2 : vector<1x8x128xf32>
    %c0_4 = arith.constant 0 : index
    %c0_5 = arith.constant 0 : index
    %c0_6 = arith.constant 0 : index
    %4 = vector.load %arg4[%c0_4, %c0_5, %c0_6] : memref<1x8x128xf32, #tpu.memory_space<vmem>>, vector<1x8x128xf32>
    tpu.vector_store %arg4[%c0_4, %c0_5, %c0_6], %3 {strides = array<i32>} : memref<1x8x128xf32, #tpu.memory_space<vmem>>, vector<1x8x128xf32>,
    return
  }
  func.func @transform_0(%arg0: i32, %arg1: i32) -> (i32, i32, i32) {
    %c0_i32 = arith.constant 0 : i32
    %c0_i32_0 = arith.constant 0 : i32
    return %arg1, %arg0, %c0_i32 : i32, i32, i32
  }
  func.func @transform_1(%arg0: i32, %arg1: i32) -> (i32, i32) {
    %c0_i32 = arith.constant 0 : i32
    %c0_i32_0 = arith.constant 0 : i32
    return %arg0, %c0_i32 : i32, i32
  }
  func.func @transform_2(%arg0: i32, %arg1: i32) -> (i32, i32, i32) {
    %c0_i32 = arith.constant 0 : i32
    %c0_i32_0 = arith.constant 0 : i32
    return %arg1, %arg0, %c0_i32 : i32, i32, i32
  }
}

</mosaic_0001>

<bundles_post_ra>
// kernel: tpu_custom_call.1
= control target key start
LH: loop header
LB: loop body
LE: loop exit
PB: predicated region body
PF: predicated region fallthrough
CT: control target
= control target key end

     0   :  { %7 = vsyncpa [#allocation3], 0  ;;  %s775_s0 = inlined_call_operand.hbm [shape: f32[2,8,128], index: 0, kind: input, shape index: {}]   ;;  %s776_s1 = inlined_call_operand.hbm [shape: f32[8,128], index: 1, kind: input, shape index: {}]   ;;  %s777_s2 = inlined_call_operand.hbm [shape: f32[2,8,128], index: 2, kind: output, shape index: {}]  }
   0x1   :  { %9 = vsyncpa [#allocation3 + $0x1], 0 }
   0x2   :  { %10 = vsyncpa [#allocation6], 0 }
   0x3   :  { %11 = vsyncpa [#allocation4], 0 }
   0x4   :  { %13 = vsyncpa [#allocation4 + $0x1], 0  ;;  %s559_s9 = smov 0   ;;  %s561_s10 = smov 0  }
   0x5   :  { %s563_s11 = smov 0   ;;  %s565_s12 = smov 0  }
   0x6   :  { %s567_s13 = smov 0   ;;  %s569_s14 = smov 0  }
   0x7 LB: > { %s307_s15 = sadd.s32 4294967295, %s539_s14   ;;  %s308_s16 = sadd.s32 4294967294, %s539_s14   ;;  %s539_s14 = sphi %s569_s14, %s19_s14   ;;  %s535_s13 = sphi %s567_s13, %s802_s13   ;;  %s531_s12 = sphi %s565_s12, %s801_s12   ;;  %s527_s11 = sphi %s563_s11, %s800_s11   ;;  %s523_s10 = sphi %s561_s10, %s799_s10   ;;  %s519_s9 = sphi %s559_s9, %s798_s9  }
   0x8   : > { %p53_p0 = scmp.ne.s32.totalorder %s523_s10, %s519_s9  ;;  %p593_p1 = scmp.eq.s32.totalorder %s307_s15, 0 }
   0x9   : > { %p597_p2 = scmp.eq.s32.totalorder %s307_s15, 1  ;;  %p111_p3 = scmp.eq.s32.totalorder %s308_s16, 1 }
   0xa   : > { %s782_s17 = scalar_select %p593_p1, 1, 0 }
   0xb   : > { %s783_s18 = scalar_select %p597_p2, 1, 0 }
   0xc   : > { %p603_p4 = por %p593_p1, %p53_p0  ;;  %p309_p5 = scmp.ge.s32.totalorder %s539_s14, 1 }
   0xd   : > { %p608_p6 = por %p111_p3, %p53_p0  ;;  %p118_p7 = scmp.lt.s32.totalorder %s539_s14, 3 }
   0xe   : > { %s784_s19 = scalar_select %p603_p4, 1, 0 }
   0xf   : > { %s785_s20 = scalar_select %p608_p6, 1, 0 }
  0x10   : > { %p613_p8 = pnand %p309_p5, %p118_p7  ;;  %s541_s22 = smov [#allocation5]  }
  0x11   : > { %s133_s23 = sshll.u32 %s541_s22, 4  ;;  %s28_s25 = sadd.s32 1, %s535_s13  ;;  %s134_s23 = int_to_ptr.vmem [resolvable:$true] %s133_s23 }
  0x12   : > { %s786_s21 = scalar_select %p613_p8, 1, 0 }
  0x13   : > { %p330_p10 = pneg %p613_p8  ;;  %s40_s26 = sadd.s32 1, %s527_s11 }
  0x14   : > { %p628_p12 = scmp.ge.s32.totalorder %s28_s25, 2  ;;  %s395_s30 = scalar_lea.hbm %s776_s1, 128 }
  0x15   : > { %p622_p11 = pnand %p330_p10, %p593_p1  ;;  %p396_p13 = scmp.ne.s32.totalorder %s776_s1, %s395_s30 }
  0x16   : > { %s788_s27 = scalar_select %p628_p12, 1, 0 }
  0x17   : > { %p397_p0 = pneg %p622_p11  ;;  %p402_p7 = scmp.lt.u32.totalorder %s395_s30, %s776_s1 }
  0x19   : > { %p398_p3 = pnand %p397_p0, %p396_p13 }
  0x1b   : > { %p399_p5 = pneg %p398_p3 }
  0x1d   : > { %p404_p10 = pnand %p402_p7, %p399_p5 }
  0x1f   : > { %407 = shalt.err (!%p404_p10)
}
  0x20   : > { %s408_s7 = scalar_lea.vmem %s134_s23, 128  ;;  %p416_p4 = scmp.lt.s32.totalorder %s134_s23, %s134_s23 }
  0x21   : > { %p409_p9 = scmp.ne.s32.totalorder %s134_s23, %s408_s7  ;;  %p417_p8 = scmp.lt.s32.totalorder %s408_s7, %s408_s7 }
  0x23   : > { %p411_p6 = pnand %p409_p9, %p397_p0  ;;  %p418_p2 = por %p417_p8, %p416_p4 }
  0x25   : > { %p412_p1 = pneg %p411_p6 }
  0x27   : > { %p419_p12 = pnand %p418_p2, %p412_p1 }
  0x29   : > { %422 = shalt.err (!%p419_p12)
}
  0x2a   : > { %333 = dma.hbm_to_vmem [thread:$0]  (!%p622_p11), %s776_s1, 128, %s134_s23, [#allocation6]  }
  0x2b   : > { %p789_p4 = scmp.ne.s32.totalorder %s788_s27, 0  ;;  %p47_p1 = scmp.ne.s32.totalorder %s527_s11, %s523_s10 }
  0x2c   : > { %p48_p2 = scmp.eq.s32.totalorder %s539_s14, 0  ;;  %p343_p6 = scmp.lt.s32.totalorder %s539_s14, 2 }
  0x2d   : > { %s804_s25 = smov (%p789_p4, %s28_s25), 0  ;;  %p790_p12 = scmp.ne.s32.totalorder %s783_s18, 0 }
  0x2e   : > { %s35_s16 = ssub.s32 %s535_s13, %s804_s25  ;;  %p49_p9 = por %p48_p2, %p47_p1 }
  0x2f   : > { %p38_p8 = scmp.eq.s32.totalorder %s35_s16, 0  ;;  %p660_p13 = por %p790_p12, %p47_p1 }
  0x30   : > { %s144_s24 = sand.u32 1, %s527_s11   ;;  %s313_s27 = sshll.u32 %s535_s13, 7 }
  0x31   : > { %s668_s28 = scalar_select %p38_p8, %s527_s11, %s40_s26  }
  0x32   : > { %s312_s23 = sshll.u32 %s144_s24, 3  ;;  %s674_s3 = scalar_lea.hbm %s775_s0, %s313_s27 }
  0x33   : > { %s148_s18 = scalar_lea.vmem [#allocation2], %s312_s23  ;;  %p678_p11 = pnand %p343_p6, %p49_p9 }
  0x34   : > { %s156_s4 = sshll.u32 %s148_s18, 4  ;;  %s145_s26 = scalar_lea.sflag [#allocation3], %s144_s24  ;;  %s676_s4 = int_to_ptr.vmem [resolvable:$true] %s156_s4 }
  0x35   : > { %s423_s6 = scalar_lea.hbm %s674_s3, 128  ;;  %p425_p3 = pneg %p678_p11 }
  0x36   : > { %p424_p0 = scmp.ne.s32.totalorder %s674_s3, %s423_s6  ;;  %s428_s15 = scalar_lea.hbm %s775_s0, 256 }
  0x37   : > { %p429_p10 = scmp.lt.u32.totalorder %s674_s3, %s775_s0  ;;  %p430_p4 = scmp.lt.u32.totalorder %s428_s15, %s423_s6 }
  0x38   : > { %p426_p5 = pnand %p425_p3, %p424_p0  ;;  %p432_p2 = scmp.lt.u32.totalorder %s423_s6, %s674_s3 }
  0x39   : > { %p431_p1 = por %p430_p4, %p429_p10 }
  0x3a   : > { %p427_p7 = pneg %p426_p5 }
  0x3b   : > { %p433_p6 = por %p432_p2, %p431_p1 }
  0x3d   : > { %p434_p8 = pnand %p433_p6, %p427_p7 }
  0x3f   : > { %437 = shalt.err (!%p434_p8)
}
  0x40   : > { %s438_s24 = scalar_lea.vmem %s676_s4, 128  ;;  %s542_s27 = smov [#allocation2]  }
  0x41   : > { %p439_p9 = scmp.ne.s32.totalorder %s676_s4, %s438_s24  ;;  %s443_s29 = sshll.u32 %s542_s27, 4  ;;  %s444_s29 = int_to_ptr.vmem [resolvable:$false] %s443_s29 }
  0x42   : > { %s445_s30 = scalar_lea.vmem %s444_s29, 256  ;;  %p446_p5 = scmp.lt.s32.totalorder %s676_s4, %s444_s29 }
  0x43   : > { %p441_p12 = pnand %p439_p9, %p425_p3  ;;  %p447_p10 = scmp.lt.s32.totalorder %s445_s30, %s438_s24 }
  0x45   : > { %p442_p0 = pneg %p441_p12  ;;  %p448_p4 = por %p447_p10, %p446_p5 }
  0x47   : > { %p449_p1 = pnand %p448_p4, %p442_p0 }
  0x49   : > { %452 = shalt.err (!%p449_p1)
}
  0x4a   : > { %337 = dma.hbm_to_vmem [thread:$0]  (!%p678_p11), %s674_s3, 128, %s676_s4, %s145_s26  }
  0x4b   : > { %p793_p7 = scmp.ne.s32.totalorder %s786_s21, 0 }
  0x4c   : > { %s710_s18 = sand.u32 (!%p793_p7), 1, %s523_s10   ;;  %p794_p3 = scmp.ne.s32.totalorder (!%p793_p7), %s784_s19, 0 }
  0x4d   : > { %165 = sbr.rel (%p793_p7) target bundleno = 113 (0x71), region = 28  ;;  %s315_s6 = sshll.u32 (!%p793_p7), %s710_s18, 3 }
  0x4e   : > { %s168_s7 = scalar_lea.sflag (!%p793_p7), [#allocation3], %s710_s18  ;;  %s171_s8 = scalar_lea.vmem (!%p793_p7), [#allocation2], %s315_s6 }
  0x54   : > { %506 = dma.done.wait (%p794_p3), %s168_s7, 128  }
  0x55   : > { %508 = vsyncadd (%p794_p3), %s168_s7, 4294967168  ;;  %p795_p2 = scmp.ne.s32.totalorder %s782_s17, 0 }
  0x57   : > { %510 = dma.done.wait (%p795_p2), [#allocation6], 128  }
  0x58   : > { %512 = vsyncadd (%p795_p2), [#allocation6], 4294967168  ;;  %s195_s21 = scalar_lea.vmem [#allocation7], %s315_s6  ;;  %s319_s4 = sshll.u32 %s531_s12, 7  ;;  %v196_v0 = vld [vmem:[%s171_s8] sm:$0xff]  ;;  %v197_v1 = vld [vmem:[#allocation5] sm:$0xff] }
  0x59   : > { %s215_s3 = sshll.u32 %s195_s21, 4  ;;  %v198_v2 = vsub.f32 %v196_v0, %v197_v1  ;;  %s728_s26 = scalar_lea.hbm %s777_s2, %s319_s4  ;;  %s723_s3 = int_to_ptr.vmem [resolvable:$true] %s215_s3 }
  0x5a   : > { %s201_s17 = scalar_lea.sflag [#allocation4], %s710_s18  ;;  %s453_s15 = scalar_lea.vmem %s723_s3, 128 }
  0x5b   : > { %199 = vst [vmem:[%s195_s21] sm:$0xff] %v198_v2  ;;  %p454_p11 = scmp.ne.s32.totalorder %s723_s3, %s453_s15  ;;  %s543_s12 = smov [#allocation7]  }
  0x5c   : > { %s457_s16 = sshll.u32 %s543_s12, 4  ;;  %s458_s16 = int_to_ptr.vmem [resolvable:$false] %s457_s16 }
  0x5d   : > { %p455_p6 = pnand %p454_p11, %p660_p13  ;;  %s459_s23 = scalar_lea.vmem %s458_s16, 256 }
  0x5e   : > { %p460_p9 = scmp.lt.s32.totalorder %s723_s3, %s458_s16  ;;  %p461_p12 = scmp.lt.s32.totalorder %s459_s23, %s453_s15 }
  0x5f   : > { %p456_p8 = pneg %p455_p6 }
  0x60   : > { %p462_p0 = por %p461_p12, %p460_p9 }
  0x62   : > { %p463_p5 = pnand %p462_p0, %p456_p8 }
  0x64   : > { %466 = shalt.err (!%p463_p5)
}
  0x65   : > { %s467_s24 = scalar_lea.hbm %s728_s26, 128  ;;  %s471_s30 = scalar_lea.hbm %s777_s2, 256 }
  0x66   : > { %p468_p10 = scmp.ne.s32.totalorder %s728_s26, %s467_s24  ;;  %p472_p7 = scmp.lt.u32.totalorder %s728_s26, %s777_s2 }
  0x67   : > { %p473_p3 = scmp.lt.u32.totalorder %s471_s30, %s467_s24  ;;  %p475_p11 = scmp.lt.u32.totalorder %s467_s24, %s728_s26 }
  0x68   : > { %p469_p4 = pnand %p468_p10, %p660_p13 }
  0x69   : > { %p474_p2 = por %p473_p3, %p472_p7 }
  0x6a   : > { %p470_p1 = pneg %p469_p4 }
  0x6b   : > { %p476_p6 = por %p475_p11, %p474_p2 }
  0x6d   : > { %p477_p8 = pnand %p476_p6, %p470_p1 }
  0x6f   : > { %480 = shalt.err (!%p477_p8)
}
  0x70   : > { %328 = dma.vmem_to_hbm [thread:$0]  (%p660_p13), %s723_s3, 128, %s728_s26, %s201_s17  }
  0x71 PF: > { %s227_s7 = sand.u32 1, %s519_s9   ;;  %p796_p9 = scmp.ne.s32.totalorder %s785_s20, 0 }
  0x72   : > { %p797_p12 = scmp.ge.s32.totalorder %s539_s14, 2  ;;  %s228_s8 = scalar_lea.sflag [#allocation4], %s227_s7 }
  0x74   : > { %p339_p0 = pnand %p797_p12, %p796_p9 }
  0x76   : > { %514 = dma.done.wait (!%p339_p0), %s228_s8, 128  }
  0x77   : > { %516 = vsyncadd (!%p339_p0), %s228_s8, 4294967168  ;;  %s19_s14 = sadd.s32 1, %s539_s14   ;;  %s798_s9 = smov %s523_s10 }
  0x78   : > { %p16_p5 = scmp.ge.s32.totalorder %s19_s14, 4   ;;  %s799_s10 = smov %s527_s11 }
  0x79   : > { %s800_s11 = smov %s668_s28  ;;  %s801_s12 = smov %s535_s13 }
  0x7a   : > { %s802_s13 = smov %s804_s25  ;;  %18 = sbr.rel (!%p16_p5) target bundleno = 7 (0x7), region = 78 }
  0x81   :  { %233 = vsyncpa [#allocation3], 1 }
  0x82   :  { %235 = vsyncpa [#allocation3 + $0x1], 1 }
  0x83   :  { %236 = vsyncpa [#allocation6], 1 }
  0x84   :  { %237 = vsyncpa [#allocation4], 1 }
  0x85   :  { %239 = vsyncpa [#allocation4 + $0x1], 1 }

</bundles_post_ra>
